<compile_context>
chip_gen: v7x
topology: tpu7x:2x2x1
jax: 0.10.0
libtpu: 0.0.40
codegen_flags: <defaults>
</compile_context>

<pallas_src>
import functools

import jax
import jax.numpy as jnp
from jax import lax
from jax.experimental import pallas as pl
from jax.experimental.pallas import tpu as pltpu


# ---------------------------------------------------------------------------
# Fused multi-head graph-attention kernel (one grid step == one batch element)
# ---------------------------------------------------------------------------
def mha_kernel(h_ref, mask_ref, wqkv_ref, bqkv_ref, wo_ref, bo_ref, o_ref, *,
               num_heads, head_dim, out_dim, scale):
    h_b = h_ref[...]                                     # [N, in_dim]

    # Fused Q/K/V projection: one [N,in_dim]@[in_dim,3*out_dim] MXU matmul.
    qkv = (jnp.dot(h_b, wqkv_ref[...], preferred_element_type=jnp.float32)
           + bqkv_ref[...])                              # [N, 3*out_dim]

    # Fold the 1/sqrt(head_dim) scale into q once (not per [N,N] score tile).
    q = qkv[:, :out_dim] * jnp.float32(scale)
    k = qkv[:, out_dim:2 * out_dim]
    v = qkv[:, 2 * out_dim:3 * out_dim]

    # Hoisted mask compare: once per batch element, reused by every head.
    mask_b = mask_ref[...] > 0.5                         # [N, N] bool (edges+self-loops)
    neg_inf = jnp.float32(-1e9)

    head_outs = []
    for hi in range(num_heads):                          # tiny static unroll (4 heads)
        cols = slice(hi * head_dim, (hi + 1) * head_dim)
        qh = q[:, cols]                                  # [N, head_dim]
        kh = k[:, cols]
        vh = v[:, cols]

        # q @ k^T without materializing a transpose: contract last dim of both.
        s = lax.dot_general(qh, kh, (((1,), (1,)), ((), ())),
                            preferred_element_type=jnp.float32)   # [N, N]
        s = jnp.where(mask_b, s, neg_inf)                # masked_fill(~edge, -1e9)

        # numerically stable softmax; divide -> EUP reciprocal (free slot)
        m = jnp.max(s, axis=-1, keepdims=True)
        p = jnp.exp(s - m)
        attn = p * pl.reciprocal(jnp.sum(p, axis=-1, keepdims=True), approx=True)
        # dropout(attn) is identity at inference time

        head_outs.append(jnp.dot(attn, vh, preferred_element_type=jnp.float32))

    # Heads occupy contiguous lane ranges -> single [N, out_dim] slab, then ONE
    # output-projection matmul against the lane-dense (128-wide) padded Wo.
    oh_all = jnp.concatenate(head_outs, axis=-1)         # [N, out_dim]
    out = (jnp.dot(oh_all, wo_ref[...], preferred_element_type=jnp.float32)
           + bo_ref[...])                                # [N, 128] lane-dense
    o_ref[...] = out.astype(o_ref.dtype)                 # unmasked full-lane store


def mha_forward(params, h, edge_mask, num_heads, lanes=128):
    """h: [B, N, in_dim]; edge_mask: [B, N, N] float (1.0 where attention allowed)."""
    B, N, in_dim = h.shape
    out_dim = params["wq"].shape[1]
    assert out_dim % num_heads == 0
    head_dim = out_dim // num_heads
    scale = 1.0 / (head_dim ** 0.5)
    assert out_dim <= lanes

    h2 = h.reshape(B * N, in_dim)

    # Fused QKV weights/bias (built once in the wrapper).
    w_qkv = jnp.concatenate([params["wq"], params["wk"], params["wv"]], axis=1)
    b_qkv = jnp.concatenate(
        [params["bq"], params["bk"], params["bv"]]).reshape(1, 3 * out_dim)

    # Lane-dense output path: zero-pad the output projection to 128 lanes.
    pad = lanes - out_dim
    wo_p = jnp.pad(params["wo"], ((0, 0), (0, pad)))
    bo_p = jnp.pad(params["bo"].reshape(1, out_dim), ((0, 0), (0, pad)))

    kernel = functools.partial(
        mha_kernel, num_heads=num_heads, head_dim=head_dim,
        out_dim=out_dim, scale=scale)

    out_pad = pl.pallas_call(
        kernel,
        out_shape=jax.ShapeDtypeStruct((B * N, lanes), jnp.float32),
        grid=(B,),                                       # batch sharded across TCs (v7x)
        in_specs=[
            pl.BlockSpec((N, in_dim), lambda b: (b, 0)),        # this batch's node rows
            pl.BlockSpec((None, N, N), lambda b: (b, 0, 0)),    # this batch's mask tile
            pl.BlockSpec(w_qkv.shape, lambda b: (0, 0)),
            pl.BlockSpec(b_qkv.shape, lambda b: (0, 0)),
            pl.BlockSpec(wo_p.shape, lambda b: (0, 0)),
            pl.BlockSpec(bo_p.shape, lambda b: (0, 0)),
        ],
        out_specs=pl.BlockSpec((N, lanes), lambda b: (b, 0)),
        compiler_params=pltpu.CompilerParams(
            dimension_semantics=("parallel",)),
    )(h2, edge_mask, w_qkv, b_qkv, wo_p, bo_p)

    return out_pad[:, :out_dim]


# ---------------------------------------------------------------------------
# Pure-JAX reference (mirrors the PyTorch forward) for a correctness check
# ---------------------------------------------------------------------------
def mha_reference(params, h, edge_mask, num_heads):
    B, N, _ = h.shape
    out_dim = params["wq"].shape[1]
    hd = out_dim // num_heads
    scale = 1.0 / (hd ** 0.5)

    q = h @ params["wq"] + params["bq"]
    k = h @ params["wk"] + params["bk"]
    v = h @ params["wv"] + params["bv"]

    def split(x):
        return x.reshape(B, N, num_heads, hd).transpose(0, 2, 1, 3)

    q, k, v = split(q), split(k), split(v)
    s = jnp.einsum("bhnd,bhmd->bhnm", q, k) * scale
    mask = edge_mask[:, None, :, :] > 0.5
    s = jnp.where(mask, s, jnp.float32(-1e9))
    attn = jax.nn.softmax(s, axis=-1)
    o = jnp.einsum("bhnm,bhmd->bhnd", attn, v)
    o = o.transpose(0, 2, 1, 3).reshape(B, N, out_dim)
    o = o @ params["wo"] + params["bo"]
    return o.reshape(B * N, out_dim)


def init_params(key, in_dim, out_dim):
    ks = jax.random.split(key, 8)
    s = 0.1
    return {
        "wq": s * jax.random.normal(ks[0], (in_dim, out_dim), jnp.float32),
        "bq": s * jax.random.normal(ks[1], (out_dim,), jnp.float32),
        "wk": s * jax.random.normal(ks[2], (in_dim, out_dim), jnp.float32),
        "bk": s * jax.random.normal(ks[3], (out_dim,), jnp.float32),
        "wv": s * jax.random.normal(ks[4], (in_dim, out_dim), jnp.float32),
        "bv": s * jax.random.normal(ks[5], (out_dim,), jnp.float32),
        "wo": s * jax.random.normal(ks[6], (out_dim, out_dim), jnp.float32),
        "bo": s * jax.random.normal(ks[7], (out_dim,), jnp.float32),
    }


if __name__ == "__main__":
    # small shapes consistent with the module
    B, N = 2, 8                 # batch_size, num_nodes per graph
    in_dim, out_dim, num_heads = 16, 32, 4

    key = jax.random.PRNGKey(0)
    k_h, k_p = jax.random.split(key)

    h = jax.random.normal(k_h, (B, N, in_dim), jnp.float32)
    params = init_params(k_p, in_dim, out_dim)

    # Deterministic graph per batch element: ring edges + self-loops, expressed as the
    # dense [B, N, N] edge mask the PyTorch forward builds from g.edges().
    idx = jnp.arange(N)
    adj = (jnp.zeros((N, N), jnp.float32)
           .at[idx, idx].set(1.0)
           .at[idx, (idx + 1) % N].set(1.0)
           .at[idx, (idx - 1) % N].set(1.0))
    edge_mask = jnp.broadcast_to(adj, (B, N, N)).astype(jnp.float32)

    out = mha_forward(params, h, edge_mask, num_heads=num_heads)
    jax.block_until_ready(out)
    assert out.shape == (B * N, out_dim)

    ref = mha_reference(params, h, edge_mask, num_heads=num_heads)
    # tolerance accounts for the EUP approx-reciprocal in the softmax normalization
    assert jnp.allclose(out, ref, atol=2e-3, rtol=2e-3), \
        float(jnp.max(jnp.abs(out - ref)))

    print("KERNEL_OK")
</pallas_src>

<mosaic_0001>
module attributes {stable_mosaic.version = 11 : i64} {
  func.func @mha_kernel(%arg0: i32, %arg1: memref<8x16xf32, #tpu.memory_space<vmem>>, %arg2: memref<1x8x8xf32, #tpu.memory_space<vmem>>, %arg3: memref<16x96xf32, #tpu.memory_space<vmem>>, %arg4: memref<1x96xf32, #tpu.memory_space<vmem>>, %arg5: memref<32x128xf32, #tpu.memory_space<vmem>>, %arg6: memref<1x128xf32, #tpu.memory_space<vmem>>, %arg7: memref<8x128xf32, #tpu.memory_space<vmem>>) attributes {dimension_semantics = [#tpu.dimension_semantics<parallel>], iteration_bounds = array<i64: 2>, scalar_prefetch = 0 : i64, scratch_operands = 0 : i64, tpu.core_type = #tpu.core_type<tc>, window_params = [{transform_indices = @transform_0, window_bounds = array<i64: 8, 16>}, {transform_indices = @transform_1, window_bounds = array<i64: 1, 8, 8>}, {pipeline_mode = #tpu.pipeline_mode<synchronous>, transform_indices = @transform_2, window_bounds = array<i64: 16, 96>}, {pipeline_mode = #tpu.pipeline_mode<synchronous>, transform_indices = @transform_3, window_bounds = array<i64: 1, 96>}, {pipeline_mode = #tpu.pipeline_mode<synchronous>, transform_indices = @transform_4, window_bounds = array<i64: 32, 128>}, {pipeline_mode = #tpu.pipeline_mode<synchronous>, transform_indices = @transform_5, window_bounds = array<i64: 1, 128>}, {transform_indices = @transform_6, window_bounds = array<i64: 8, 128>}]} {
    %c0 = arith.constant 0 : index
    %c0_0 = arith.constant 0 : index
    %0 = vector.load %arg1[%c0, %c0_0] : memref<8x16xf32, #tpu.memory_space<vmem>>, vector<8x16xf32>
    %c0_1 = arith.constant 0 : index
    %c0_2 = arith.constant 0 : index
    %1 = vector.load %arg3[%c0_1, %c0_2] : memref<16x96xf32, #tpu.memory_space<vmem>>, vector<16x96xf32>
    %cst = arith.constant dense<0.000000e+00> : vector<8x96xf32>
    %2 = tpu.matmul %0, %1, %cst {dimension_numbers = #tpu.dot_dimension_numbers<[1], [0], [0], [1], [0, 0, 1, 1], [], []>} : vector<8x16xf32>, vector<16x96xf32>, vector<8x96xf32> -> vector<8x96xf32>
    %c0_3 = arith.constant 0 : index
    %c0_4 = arith.constant 0 : index
    %3 = vector.load %arg4[%c0_3, %c0_4] : memref<1x96xf32, #tpu.memory_space<vmem>>, vector<1x96xf32>
    %4 = vector.broadcast %3 : vector<1x96xf32> to vector<8x96xf32>
    %5 = arith.addf %2, %4 : vector<8x96xf32>
    %6 = vector.extract_strided_slice %5 {offsets = [0, 0], sizes = [8, 32], strides = [1, 1]} : vector<8x96xf32> to vector<8x32xf32>
    %cst_5 = arith.constant 0.353553385 : f32
    %7 = vector.broadcast %cst_5 : f32 to vector<8x32xf32>
    %8 = arith.mulf %6, %7 : vector<8x32xf32>
    %9 = vector.extract_strided_slice %5 {offsets = [0, 32], sizes = [8, 32], strides = [1, 1]} : vector<8x96xf32> to vector<8x32xf32>
    %10 = vector.extract_strided_slice %5 {offsets = [0, 64], sizes = [8, 32], strides = [1, 1]} : vector<8x96xf32> to vector<8x32xf32>
    %c0_6 = arith.constant 0 : index
    %c0_7 = arith.constant 0 : index
    %c0_8 = arith.constant 0 : index
    %11 = vector.load %arg2[%c0_6, %c0_7, %c0_8] : memref<1x8x8xf32, #tpu.memory_space<vmem>>, vector<1x8x8xf32>
    %12 = vector.shape_cast %11 : vector<1x8x8xf32> to vector<8x8xf32>
    %cst_9 = arith.constant 5.000000e-01 : f32
    %13 = vector.broadcast %cst_9 : f32 to vector<8x8xf32>
    %14 = arith.cmpf ogt, %12, %13 : vector<8x8xf32>
    %15 = vector.extract_strided_slice %8 {offsets = [0, 0], sizes = [8, 8], strides = [1, 1]} : vector<8x32xf32> to vector<8x8xf32>
    %16 = vector.extract_strided_slice %9 {offsets = [0, 0], sizes = [8, 8], strides = [1, 1]} : vector<8x32xf32> to vector<8x8xf32>
    %17 = vector.extract_strided_slice %10 {offsets = [0, 0], sizes = [8, 8], strides = [1, 1]} : vector<8x32xf32> to vector<8x8xf32>
    %cst_10 = arith.constant dense<0.000000e+00> : vector<8x8xf32>
    %18 = tpu.matmul %15, %16, %cst_10 {dimension_numbers = #tpu.dot_dimension_numbers<[1], [1], [0], [0], [0, 0, 1, 0], [], []>} : vector<8x8xf32>, vector<8x8xf32>, vector<8x8xf32> -> vector<8x8xf32>
    %cst_11 = arith.constant -1.000000e+09 : f32
    %19 = vector.broadcast %cst_11 : f32 to vector<8x8xf32>
    %20 = arith.select %14, %18, %19 : vector<8x8xi1>, vector<8x8xf32>
    %cst_12 = arith.constant dense<0xFF800000> : vector<8xf32>
    %21 = vector.multi_reduction <maximumf>, %20, %cst_12 [1] : vector<8x8xf32> to vector<8xf32>
    %22 = vector.shape_cast %21 : vector<8xf32> to vector<8x1xf32>
    %23 = vector.broadcast %22 : vector<8x1xf32> to vector<8x8xf32>
    %24 = arith.subf %20, %23 : vector<8x8xf32>
    %25 = math.exp %24 : vector<8x8xf32>
    %cst_13 = arith.constant dense<0.000000e+00> : vector<8xf32>
    %26 = vector.multi_reduction <add>, %25, %cst_13 [1] : vector<8x8xf32> to vector<8xf32>
    %27 = vector.shape_cast %26 : vector<8xf32> to vector<8x1xf32>
    %28 = tpu.reciprocal %27 {approx = true} : vector<8x1xf32> -> vector<8x1xf32>
    %29 = vector.broadcast %28 : vector<8x1xf32> to vector<8x8xf32>
    %30 = arith.mulf %25, %29 : vector<8x8xf32>
    %cst_14 = arith.constant dense<0.000000e+00> : vector<8x8xf32>
    %31 = tpu.matmul %30, %17, %cst_14 {dimension_numbers = #tpu.dot_dimension_numbers<[1], [0], [0], [1], [0, 0, 1, 1], [], []>} : vector<8x8xf32>, vector<8x8xf32>, vector<8x8xf32> -> vector<8x8xf32>
    %32 = vector.extract_strided_slice %8 {offsets = [0, 8], sizes = [8, 8], strides = [1, 1]} : vector<8x32xf32> to vector<8x8xf32>
    %33 = vector.extract_strided_slice %9 {offsets = [0, 8], sizes = [8, 8], strides = [1, 1]} : vector<8x32xf32> to vector<8x8xf32>
    %34 = vector.extract_strided_slice %10 {offsets = [0, 8], sizes = [8, 8], strides = [1, 1]} : vector<8x32xf32> to vector<8x8xf32>
    %cst_15 = arith.constant dense<0.000000e+00> : vector<8x8xf32>
    %35 = tpu.matmul %32, %33, %cst_15 {dimension_numbers = #tpu.dot_dimension_numbers<[1], [1], [0], [0], [0, 0, 1, 0], [], []>} : vector<8x8xf32>, vector<8x8xf32>, vector<8x8xf32> -> vector<8x8xf32>
    %cst_16 = arith.constant -1.000000e+09 : f32
    %36 = vector.broadcast %cst_16 : f32 to vector<8x8xf32>
    %37 = arith.select %14, %35, %36 : vector<8x8xi1>, vector<8x8xf32>
    %cst_17 = arith.constant dense<0xFF800000> : vector<8xf32>
    %38 = vector.multi_reduction <maximumf>, %37, %cst_17 [1] : vector<8x8xf32> to vector<8xf32>
    %39 = vector.shape_cast %38 : vector<8xf32> to vector<8x1xf32>
    %40 = vector.broadcast %39 : vector<8x1xf32> to vector<8x8xf32>
    %41 = arith.subf %37, %40 : vector<8x8xf32>
    %42 = math.exp %41 : vector<8x8xf32>
    %cst_18 = arith.constant dense<0.000000e+00> : vector<8xf32>
    %43 = vector.multi_reduction <add>, %42, %cst_18 [1] : vector<8x8xf32> to vector<8xf32>
    %44 = vector.shape_cast %43 : vector<8xf32> to vector<8x1xf32>
    %45 = tpu.reciprocal %44 {approx = true} : vector<8x1xf32> -> vector<8x1xf32>
    %46 = vector.broadcast %45 : vector<8x1xf32> to vector<8x8xf32>
    %47 = arith.mulf %42, %46 : vector<8x8xf32>
    %cst_19 = arith.constant dense<0.000000e+00> : vector<8x8xf32>
    %48 = tpu.matmul %47, %34, %cst_19 {dimension_numbers = #tpu.dot_dimension_numbers<[1], [0], [0], [1], [0, 0, 1, 1], [], []>} : vector<8x8xf32>, vector<8x8xf32>, vector<8x8xf32> -> vector<8x8xf32>
    %49 = vector.extract_strided_slice %8 {offsets = [0, 16], sizes = [8, 8], strides = [1, 1]} : vector<8x32xf32> to vector<8x8xf32>
    %50 = vector.extract_strided_slice %9 {offsets = [0, 16], sizes = [8, 8], strides = [1, 1]} : vector<8x32xf32> to vector<8x8xf32>
    %51 = vector.extract_strided_slice %10 {offsets = [0, 16], sizes = [8, 8], strides = [1, 1]} : vector<8x32xf32> to vector<8x8xf32>
    %cst_20 = arith.constant dense<0.000000e+00> : vector<8x8xf32>
    %52 = tpu.matmul %49, %50, %cst_20 {dimension_numbers = #tpu.dot_dimension_numbers<[1], [1], [0], [0], [0, 0, 1, 0], [], []>} : vector<8x8xf32>, vector<8x8xf32>, vector<8x8xf32> -> vector<8x8xf32>
    %cst_21 = arith.constant -1.000000e+09 : f32
    %53 = vector.broadcast %cst_21 : f32 to vector<8x8xf32>
    %54 = arith.select %14, %52, %53 : vector<8x8xi1>, vector<8x8xf32>
    %cst_22 = arith.constant dense<0xFF800000> : vector<8xf32>
    %55 = vector.multi_reduction <maximumf>, %54, %cst_22 [1] : vector<8x8xf32> to vector<8xf32>
    %56 = vector.shape_cast %55 : vector<8xf32> to vector<8x1xf32>
    %57 = vector.broadcast %56 : vector<8x1xf32> to vector<8x8xf32>
    %58 = arith.subf %54, %57 : vector<8x8xf32>
    %59 = math.exp %58 : vector<8x8xf32>
    %cst_23 = arith.constant dense<0.000000e+00> : vector<8xf32>
    %60 = vector.multi_reduction <add>, %59, %cst_23 [1] : vector<8x8xf32> to vector<8xf32>
    %61 = vector.shape_cast %60 : vector<8xf32> to vector<8x1xf32>
    %62 = tpu.reciprocal %61 {approx = true} : vector<8x1xf32> -> vector<8x1xf32>
    %63 = vector.broadcast %62 : vector<8x1xf32> to vector<8x8xf32>
    %64 = arith.mulf %59, %63 : vector<8x8xf32>
    %cst_24 = arith.constant dense<0.000000e+00> : vector<8x8xf32>
    %65 = tpu.matmul %64, %51, %cst_24 {dimension_numbers = #tpu.dot_dimension_numbers<[1], [0], [0], [1], [0, 0, 1, 1], [], []>} : vector<8x8xf32>, vector<8x8xf32>, vector<8x8xf32> -> vector<8x8xf32>
    %66 = vector.extract_strided_slice %8 {offsets = [0, 24], sizes = [8, 8], strides = [1, 1]} : vector<8x32xf32> to vector<8x8xf32>
    %67 = vector.extract_strided_slice %9 {offsets = [0, 24], sizes = [8, 8], strides = [1, 1]} : vector<8x32xf32> to vector<8x8xf32>
    %68 = vector.extract_strided_slice %10 {offsets = [0, 24], sizes = [8, 8], strides = [1, 1]} : vector<8x32xf32> to vector<8x8xf32>
    %cst_25 = arith.constant dense<0.000000e+00> : vector<8x8xf32>
    %69 = tpu.matmul %66, %67, %cst_25 {dimension_numbers = #tpu.dot_dimension_numbers<[1], [1], [0], [0], [0, 0, 1, 0], [], []>} : vector<8x8xf32>, vector<8x8xf32>, vector<8x8xf32> -> vector<8x8xf32>
    %cst_26 = arith.constant -1.000000e+09 : f32
    %70 = vector.broadcast %cst_26 : f32 to vector<8x8xf32>
    %71 = arith.select %14, %69, %70 : vector<8x8xi1>, vector<8x8xf32>
    %cst_27 = arith.constant dense<0xFF800000> : vector<8xf32>
    %72 = vector.multi_reduction <maximumf>, %71, %cst_27 [1] : vector<8x8xf32> to vector<8xf32>
    %73 = vector.shape_cast %72 : vector<8xf32> to vector<8x1xf32>
    %74 = vector.broadcast %73 : vector<8x1xf32> to vector<8x8xf32>
    %75 = arith.subf %71, %74 : vector<8x8xf32>
    %76 = math.exp %75 : vector<8x8xf32>
    %cst_28 = arith.constant dense<0.000000e+00> : vector<8xf32>
    %77 = vector.multi_reduction <add>, %76, %cst_28 [1] : vector<8x8xf32> to vector<8xf32>
    %78 = vector.shape_cast %77 : vector<8xf32> to vector<8x1xf32>
    %79 = tpu.reciprocal %78 {approx = true} : vector<8x1xf32> -> vector<8x1xf32>
    %80 = vector.broadcast %79 : vector<8x1xf32> to vector<8x8xf32>
    %81 = arith.mulf %76, %80 : vector<8x8xf32>
    %cst_29 = arith.constant dense<0.000000e+00> : vector<8x8xf32>
    %82 = tpu.matmul %81, %68, %cst_29 {dimension_numbers = #tpu.dot_dimension_numbers<[1], [0], [0], [1], [0, 0, 1, 1], [], []>} : vector<8x8xf32>, vector<8x8xf32>, vector<8x8xf32> -> vector<8x8xf32>
    %83 = tpu.concatenate %31, %48, %65, %82 in 1 : vector<8x8xf32>, vector<8x8xf32>, vector<8x8xf32>, vector<8x8xf32> -> vector<8x32xf32>
    %c0_30 = arith.constant 0 : index
    %c0_31 = arith.constant 0 : index
    %84 = vector.load %arg5[%c0_30, %c0_31] : memref<32x128xf32, #tpu.memory_space<vmem>>, vector<32x128xf32>
    %cst_32 = arith.constant dense<0.000000e+00> : vector<8x128xf32>
    %85 = tpu.matmul %83, %84, %cst_32 {dimension_numbers = #tpu.dot_dimension_numbers<[1], [0], [0], [1], [0, 0, 1, 1], [], []>} : vector<8x32xf32>, vector<32x128xf32>, vector<8x128xf32> -> vector<8x128xf32>
    %c0_33 = arith.constant 0 : index
    %c0_34 = arith.constant 0 : index
    %86 = vector.load %arg6[%c0_33, %c0_34] : memref<1x128xf32, #tpu.memory_space<vmem>>, vector<1x128xf32>
    %87 = vector.broadcast %86 : vector<1x128xf32> to vector<8x128xf32>
    %88 = arith.addf %85, %87 : vector<8x128xf32>
    %c0_35 = arith.constant 0 : index
    %c0_36 = arith.constant 0 : index
    %89 = vector.load %arg7[%c0_35, %c0_36] : memref<8x128xf32, #tpu.memory_space<vmem>>, vector<8x128xf32>
    tpu.vector_store %arg7[%c0_35, %c0_36], %88 {strides = array<i32>} : memref<8x128xf32, #tpu.memory_space<vmem>>, vector<8x128xf32>,
    return
  }
  func.func @transform_0(%arg0: i32) -> (i32, i32) {
    %c0_i32 = arith.constant 0 : i32
    %c0_i32_0 = arith.constant 0 : i32
    return %arg0, %c0_i32 : i32, i32
  }
  func.func @transform_1(%arg0: i32) -> (i32, i32, i32) {
    %c0_i32 = arith.constant 0 : i32
    %c0_i32_0 = arith.constant 0 : i32
    %c0_i32_1 = arith.constant 0 : i32
    return %arg0, %c0_i32, %c0_i32_0 : i32, i32, i32
  }
  func.func @transform_2(%arg0: i32) -> (i32, i32) {
    %c0_i32 = arith.constant 0 : i32
    %c0_i32_0 = arith.constant 0 : i32
    %c0_i32_1 = arith.constant 0 : i32
    return %c0_i32, %c0_i32_0 : i32, i32
  }
  func.func @transform_3(%arg0: i32) -> (i32, i32) {
    %c0_i32 = arith.constant 0 : i32
    %c0_i32_0 = arith.constant 0 : i32
    %c0_i32_1 = arith.constant 0 : i32
    return %c0_i32, %c0_i32_0 : i32, i32
  }
  func.func @transform_4(%arg0: i32) -> (i32, i32) {
    %c0_i32 = arith.constant 0 : i32
    %c0_i32_0 = arith.constant 0 : i32
    %c0_i32_1 = arith.constant 0 : i32
    return %c0_i32, %c0_i32_0 : i32, i32
  }
  func.func @transform_5(%arg0: i32) -> (i32, i32) {
    %c0_i32 = arith.constant 0 : i32
    %c0_i32_0 = arith.constant 0 : i32
    %c0_i32_1 = arith.constant 0 : i32
    return %c0_i32, %c0_i32_0 : i32, i32
  }
  func.func @transform_6(%arg0: i32) -> (i32, i32) {
    %c0_i32 = arith.constant 0 : i32
    %c0_i32_0 = arith.constant 0 : i32
    return %arg0, %c0_i32 : i32, i32
  }
}

</mosaic_0001>

<bundles_post_ra>
// kernel: tpu_custom_call.1
= control target key start
LH: loop header
LB: loop body
LE: loop exit
PB: predicated region body
PF: predicated region fallthrough
CT: control target
= control target key end

     0   :  { %s2152_s0 = inlined_call_operand.hbm [shape: f32[16,16], index: 0, kind: input, shape index: {}]   ;;  %s2153_s1 = inlined_call_operand.hbm [shape: f32[2,8,8], index: 1, kind: input, shape index: {}]   ;;  %s2154_s2 = inlined_call_operand.hbm [shape: f32[16,96], index: 2, kind: input, shape index: {}]   ;;  %s2155_s3 = inlined_call_operand.vmem [shape: f32[1,96], index: 3, kind: input, shape index: {}]   ;;  %s2156_s4 = inlined_call_operand.hbm [shape: f32[32,128], index: 4, kind: input, shape index: {}]   ;;  %s2157_s5 = inlined_call_operand.vmem [shape: f32[1,128], index: 5, kind: input, shape index: {}]   ;;  %s2158_s6 = inlined_call_operand.hbm [shape: f32[16,128], index: 6, kind: output, shape index: {}]  }
   0x1   :  { %2163 = sst [smem:[#allocation17_spill]] %s2154_s2 }
   0x2   :  { %2164 = sst [smem:[#allocation18_spill]] %s2156_s4 }
   0x3   :  { %11 = vsyncpa [#allocation3], 0 }
   0x4   :  { %13 = vsyncpa [#allocation3 + $0x1], 0 }
   0x5   :  { %14 = vsyncpa [#allocation6], 0 }
   0x6   :  { %16 = vsyncpa [#allocation6 + $0x1], 0 }
   0x7   :  { %17 = vsyncpa [#allocation9], 0 }
   0x8   :  { %18 = vsyncpa [#allocation4], 0 }
   0x9   :  { %20 = vsyncpa [#allocation4 + $0x1], 0  ;;  %s1801_s21 = smov 0   ;;  %s1803_s22 = smov 0  }
   0xa   :  { %s1805_s23 = smov 0   ;;  %s1807_s24 = smov 0  }
   0xb LB: > { %s1822_s25 = sadd.s32 4294967295, %s1740_s24   ;;  %s1313_s26 = sadd.s32 4294967294, %s1740_s24   ;;  %s1740_s24 = sphi %s1807_s24, %s2188_s24   ;;  %s1736_s23 = sphi %s1805_s23, %s2187_s23   ;;  %s1732_s22 = sphi %s1803_s22, %s2186_s22   ;;  %s1728_s21 = sphi %s1801_s21, %s2185_s21  }
   0xc   : > { %p46_p0 = scmp.ne.s32.totalorder %s1732_s22, %s1728_s21  ;;  %p2159_p1 = scmp.eq.s32.totalorder %s1822_s25, 0 }
   0xd   : > { %p186_p3 = scmp.eq.s32.totalorder %s1313_s26, 1  ;;  %p1314_p5 = scmp.ge.s32.totalorder %s1740_s24, 1 }
   0xe   : > { %p1831_p4 = por %p2159_p1, %p46_p0  ;;  %p193_p7 = scmp.lt.s32.totalorder %s1740_s24, 3 }
   0xf   : > { %p1836_p6 = por %p186_p3, %p46_p0  ;;  %s1742_s30 = smov [#allocation7]  }
  0x10   : > { %s2165_s27 = scalar_select %p1831_p4, 1, 0 }
  0x11   : > { %s2166_s28 = scalar_select %p1836_p6, 1, 0 }
  0x12   : > { %p1841_p8 = pnand %p1314_p5, %p193_p7  ;;  %s205_s7 = sshll.u32 %s1742_s30, 4  ;;  %s1845_s7 = int_to_ptr.vmem [resolvable:$true] %s205_s7 }
  0x13   : > { %s1743_s9 = smov [#allocation8]   ;;  %s2169_s2 = sld [smem:[#allocation17_spill]] }
  0x14   : > { %s2167_s29 = scalar_select %p1841_p8, 1, 0 }
  0x15   : > { %p1453_p9 = pneg %p1841_p8  ;;  %s221_s10 = sshll.u32 %s1743_s9, 4  ;;  %s1856_s10 = int_to_ptr.vmem [resolvable:$true] %s221_s10 }
  0x17   : > { %p1852_p11 = pnand %p1453_p9, %p2159_p1 }
  0x19   : > { %s1546_s13 = scalar_lea.hbm %s2169_s2, 256  ;;  %p1548_p13 = pneg %p1852_p11 }
  0x1a   : > { %p1547_p12 = scmp.ne.s32.totalorder %s2169_s2, %s1546_s13  ;;  %p1553_p5 = scmp.lt.u32.totalorder %s1546_s13, %s2169_s2 }
  0x1c   : > { %p1549_p0 = pnand %p1548_p13, %p1547_p12 }
  0x1e   : > { %p1550_p3 = pneg %p1549_p0 }
  0x20   : > { %p1555_p7 = pnand %p1553_p5, %p1550_p3 }
  0x22   : > { %1558 = shalt.err (!%p1555_p7)
}
  0x23   : > { %s1559_s18 = scalar_lea.vmem %s1845_s7, 256  ;;  %p1567_p2 = scmp.lt.s32.totalorder %s1845_s7, %s1845_s7 }
  0x24   : > { %p1560_p9 = scmp.ne.s32.totalorder %s1845_s7, %s1559_s18  ;;  %p1568_p12 = scmp.lt.s32.totalorder %s1559_s18, %s1559_s18 }
  0x26   : > { %p1562_p10 = pnand %p1560_p9, %p1548_p13  ;;  %p1569_p0 = por %p1568_p12, %p1567_p2 }
  0x28   : > { %p1563_p1 = pneg %p1562_p10 }
  0x2a   : > { %p1570_p6 = pnand %p1569_p0, %p1563_p1 }
  0x2c   : > { %1573 = shalt.err (!%p1570_p6)
}
  0x2d   : > { %s1744_s19 = smov 128   ;;  %s1745_s20 = smov 8  }
  0x2e   : > { %1456 = dma.hbm_to_vmem [thread:$0]  (!%p1852_p11), %s2169_s2, 256, %s1845_s7, [#allocation6], %s1744_s19, %s1744_s19, %s1745_s20  }
  0x2f   : > { %s2170_s4 = sld [smem:[#allocation18_spill]] }
  0x35   : > { %s1574_s12 = scalar_lea.hbm %s2170_s4, 512 }
  0x36   : > { %p1575_p2 = scmp.ne.s32.totalorder %s2170_s4, %s1574_s12  ;;  %p1581_p10 = scmp.lt.u32.totalorder %s1574_s12, %s2170_s4 }
  0x38   : > { %p1577_p1 = pnand %p1575_p2, %p1548_p13 }
  0x3a   : > { %p1578_p6 = pneg %p1577_p1 }
  0x3c   : > { %p1583_p3 = pnand %p1581_p10, %p1578_p6 }
  0x3e   : > { %1586 = shalt.err (!%p1583_p3)
}
  0x3f   : > { %s1587_s7 = scalar_lea.vmem %s1856_s10, 512  ;;  %p1595_p12 = scmp.lt.s32.totalorder %s1856_s10, %s1856_s10 }
  0x40   : > { %p1588_p5 = scmp.ne.s32.totalorder %s1856_s10, %s1587_s7  ;;  %p1596_p0 = scmp.lt.s32.totalorder %s1587_s7, %s1587_s7 }
  0x42   : > { %p1590_p7 = pnand %p1588_p5, %p1548_p13  ;;  %p1597_p2 = por %p1596_p0, %p1595_p12 }
  0x44   : > { %p1591_p9 = pneg %p1590_p7 }
  0x46   : > { %p1598_p1 = pnand %p1597_p2, %p1591_p9 }
  0x48   : > { %1601 = shalt.err (!%p1598_p1)
}
  0x49   : > { %1459 = dma.hbm_to_vmem [thread:$0]  (!%p1852_p11), %s2170_s4, 512, %s1856_s10, [#allocation9], %s1744_s19, %s1744_s19, %s1745_s20  }
  0x4a   : > { %s1911_s26 = sadd.s32 1, %s1740_s24   ;;  %s33_s8 = sadd.s32 1, %s1736_s23 }
  0x4b   : > { %s30_s30 = ssub.s32 %s1740_s24, %s1911_s26  ;;  %p40_p13 = scmp.ne.s32.totalorder %s1736_s23, %s1732_s22 }
  0x4c   : > { %p31_p6 = scmp.eq.s32.totalorder %s30_s30, 0  ;;  %p41_p10 = scmp.eq.s32.totalorder %s1740_s24, 0 }
  0x4d   : > { %p2171_p3 = scmp.eq.s32.totalorder %s1822_s25, 1  ;;  %p1473_p7 = scmp.lt.s32.totalorder %s1740_s24, 2 }
  0x4e   : > { %s1927_s11 = scalar_select %p31_p6, %s1736_s23, %s33_s8  }
  0x4f   : > { %p1921_p5 = por %p2171_p3, %p40_p13  ;;  %p42_p9 = por %p41_p10, %p40_p13 }
  0x50   : > { %2173 = sst [smem:[#allocation16_spill]] %s1927_s11  ;;  %s238_s12 = sand.u32 1, %s1736_s23  }
  0x51   : > { %s2172_s9 = scalar_select %p1921_p5, 1, 0 }
  0x52   : > { %s1930_s10 = sshll.u32 %s238_s12, 3  ;;  %s1319_s19 = sshll.u32 %s1740_s24, 7 }
  0x53   : > { %s1936_s14 = scalar_lea.hbm %s2152_s0, %s1319_s19  ;;  %s242_s15 = scalar_lea.vmem [#allocation2], %s1930_s10 }
  0x54   : > { %s249_s16 = sshll.u32 %s242_s15, 4  ;;  %p1941_p11 = pnand %p1473_p7, %p42_p9  ;;  %s1939_s16 = int_to_ptr.vmem [resolvable:$true] %s249_s16 }
  0x55   : > { %s1948_s8 = scalar_lea.hbm %s2153_s1, %s1319_s19  ;;  %s256_s30 = sand.u32 1, %s1740_s24  }
  0x56   : > { %s239_s20 = scalar_lea.sflag [#allocation3], %s238_s12  ;;  %s1602_s13 = scalar_lea.hbm %s1936_s14, 128 }
  0x57   : > { %p1603_p12 = scmp.ne.s32.totalorder %s1936_s14, %s1602_s13  ;;  %p1604_p0 = pneg %p1941_p11 }
  0x58   : > { %s1607_s4 = scalar_lea.hbm %s2152_s0, 256  ;;  %p1608_p13 = scmp.lt.u32.totalorder %s1936_s14, %s2152_s0 }
  0x59   : > { %p1605_p2 = pnand %p1604_p0, %p1603_p12  ;;  %p1609_p6 = scmp.lt.u32.totalorder %s1607_s4, %s1602_s13 }
  0x5a   : > { %p1611_p3 = scmp.lt.u32.totalorder %s1602_s13, %s1936_s14 }
  0x5b   : > { %p1606_p1 = pneg %p1605_p2  ;;  %p1610_p10 = por %p1609_p6, %p1608_p13 }
  0x5d   : > { %p1612_p7 = por %p1611_p3, %p1610_p10 }
  0x5f   : > { %p1613_p9 = pnand %p1612_p7, %p1606_p1 }
  0x61   : > { %1616 = shalt.err (!%p1613_p9)
}
  0x62   : > { %s1617_s12 = scalar_lea.vmem %s1939_s16, 128  ;;  %s1746_s2 = smov [#allocation2]  }
  0x63   : > { %p1618_p12 = scmp.ne.s32.totalorder %s1939_s16, %s1617_s12  ;;  %s1622_s19 = sshll.u32 %s1746_s2, 4  ;;  %s1623_s19 = int_to_ptr.vmem [resolvable:$false] %s1622_s19 }
  0x64   : > { %s1624_s11 = scalar_lea.vmem %s1623_s19, 256  ;;  %p1625_p4 = scmp.lt.s32.totalorder %s1939_s16, %s1623_s19 }
  0x65   : > { %p1620_p2 = pnand %p1618_p12, %p1604_p0  ;;  %p1626_p13 = scmp.lt.s32.totalorder %s1624_s11, %s1617_s12 }
  0x67   : > { %p1621_p5 = pneg %p1620_p2  ;;  %p1627_p6 = por %p1626_p13, %p1625_p4 }
  0x69   : > { %p1628_p10 = pnand %p1627_p6, %p1621_p5 }
  0x6b   : > { %1631 = shalt.err (!%p1628_p10)
}
  0x6c   : > { %1463 = dma.hbm_to_vmem [thread:$0]  (!%p1941_p11), %s1936_s14, 128, %s1939_s16, %s239_s20  }
  0x6d   : > { %s260_s4 = scalar_lea.vmem [#allocation5], %s1930_s10  ;;  %s257_s13 = scalar_lea.sflag [#allocation6], %s256_s30 }
  0x6e   : > { %s267_s18 = sshll.u32 %s260_s4, 4  ;;  %s1632_s15 = scalar_lea.hbm %s1948_s8, 128  ;;  %s268_s18 = int_to_ptr.vmem [resolvable:$true] %s267_s18 }
  0x6f   : > { %p1633_p4 = scmp.ne.s32.totalorder %s1948_s8, %s1632_s15  ;;  %s1637_s2 = scalar_lea.hbm %s2153_s1, 256 }
  0x70   : > { %p1638_p3 = scmp.lt.u32.totalorder %s1948_s8, %s2153_s1  ;;  %p1639_p7 = scmp.lt.u32.totalorder %s1637_s2, %s1632_s15 }
  0x71   : > { %p1635_p5 = pnand %p1633_p4, %p1604_p0  ;;  %p1641_p12 = scmp.lt.u32.totalorder %s1632_s15, %s1948_s8 }
  0x72   : > { %p1640_p9 = por %p1639_p7, %p1638_p3 }
  0x73   : > { %p1636_p1 = pneg %p1635_p5 }
  0x74   : > { %p1642_p2 = por %p1641_p12, %p1640_p9 }
  0x76   : > { %p1643_p13 = pnand %p1642_p2, %p1636_p1 }
  0x78   : > { %1646 = shalt.err (!%p1643_p13)
}
  0x79   : > { %s1647_s10 = scalar_lea.vmem %s268_s18, 128  ;;  %s1747_s14 = smov [#allocation5]  }
  0x7a   : > { %p1648_p6 = scmp.ne.s32.totalorder %s268_s18, %s1647_s10  ;;  %s1652_s16 = sshll.u32 %s1747_s14, 4  ;;  %s1653_s16 = int_to_ptr.vmem [resolvable:$false] %s1652_s16 }
  0x7b   : > { %s1654_s30 = scalar_lea.vmem %s1653_s16, 256  ;;  %p1655_p5 = scmp.lt.s32.totalorder %s268_s18, %s1653_s16 }
  0x7c   : > { %p1650_p10 = pnand %p1648_p6, %p1604_p0  ;;  %p1656_p8 = scmp.lt.s32.totalorder %s1654_s30, %s1647_s10 }
  0x7e   : > { %p1651_p4 = pneg %p1650_p10  ;;  %p1657_p3 = por %p1656_p8, %p1655_p5 }
  0x80   : > { %p1658_p7 = pnand %p1657_p3, %p1651_p4 }
  0x82   : > { %1661 = shalt.err (!%p1658_p7)
}
  0x83   : > { %1466 = dma.hbm_to_vmem [thread:$0]  (!%p1941_p11), %s1948_s8, 128, %s268_s18, %s257_s13  }
  0x84   : > { %p2175_p1 = scmp.ne.s32.totalorder %s2167_s29, 0 }
  0x85   : > { %s2001_s20 = sand.u32 (!%p2175_p1), 1, %s1732_s22   ;;  %p2176_p8 = scmp.ne.s32.totalorder (!%p2175_p1), %s2165_s27, 0 }
  0x86   : > { %276 = sbr.rel (%p2175_p1) target bundleno = 1631 (0x65f), region = 44  ;;  %s2004_s4 = sshll.u32 (!%p2175_p1), %s2001_s20, 3 }
  0x87   : > { %s279_s15 = scalar_lea.sflag (!%p2175_p1), [#allocation3], %s2001_s20  ;;  %s282_s17 = scalar_lea.vmem (!%p2175_p1), [#allocation2], %s2004_s4 }
  0x8d   : > { %1707 = dma.done.wait (%p2176_p8), %s279_s15, 128  }
  0x8e   : > { %1709 = vsyncadd (%p2176_p8), %s279_s15, 4294967168  ;;  %s287_s29 = sand.u32 1, %s1822_s25   ;;  %s291_s8 = scalar_lea.vmem [#allocation5], %s2004_s4 }
  0x8f   : > { %s288_s7 = scalar_lea.sflag [#allocation6], %s287_s29 }
  0x90   : > { %1711 = dma.done.wait (%p2176_p8), %s288_s7, 128  }
  0x91   : > { %1713 = vsyncadd (%p2176_p8), %s288_s7, 4294967168  ;;  %p2177_p11 = scmp.eq.s32.totalorder %s1822_s25, 0 }
  0x93   : > { %1715 = dma.done.wait (%p2177_p11), [#allocation6], 256   ;;  %p2178_p0 = pmov %p2177_p11 }
  0x95   : > { %1717 = vsyncadd (%p2178_p0), [#allocation6], 4294967040  ;;  %p2179_p9 = pmov %p2178_p0 }
  0x96   : > { %p2180_p12 = pmov %p2178_p0 }
  0x97   : > { %1719 = dma.done.wait (%p2179_p9), [#allocation9], 512  }
  0x98   : > { %1721 = vsyncadd (%p2180_p12), [#allocation9], 4294966784  ;;  %v1748_v0 = vmov 0.0|0.0   ;;  %vm1749_vm0 = vmmov 0   ;;  %v1750_v1 = vmov 0.0   ;;  %v334_v2 = vld [vmem:[#allocation7] sm:$0xff] }
  0x99   : > { %1430 = vmatprep.subr.bf16.mxu0 %v1748_v0  ;;  %1376 = vmatprep.mubr.msk.f32.mxu0 %vm1749_vm0, %v1750_v1  ;;  %v335_v3 = vld [vmem:[#allocation7 + $0x8] sm:$0xff]  ;;  %vm343_vm1 = vcmask 130048   ;;  %v1328_v6 = vld [vmem:[%s2155_s3] ss:$0 sm:$0xff]  ;;  %s1751_s13 = smov 96   ;;  %s1752_s12 = smov 120  }
  0x9a   : > { %1379 = vmatprep.subr.mxu1 %v1750_v1  ;;  %1381 = vmatprep.mubr.msk.f32.mxu1 %vm1749_vm0, %v1750_v1  ;;  %v1431_v4 = vpack.c.bf16 %v335_v3, %v334_v2  ;;  %v333_v5 = vld [vmem:[%s282_s17] sm:$0xff]  ;;  %s1753_s2 = smov 88   ;;  %s1754_s19 = smov 80   ;;  %vm423_vm2 = vcmask 64512   ;;  %v418_v18 = vld [vmem:[%s291_s8] sm:$0xff]  ;;  %vm1099_vm4 = vcmask 195584  }
  0x9b   : > { %s1755_s11 = smov 112   ;;  %s1756_s10 = smov 72   ;;  %vm419_vm3 = vcmp.gt.f32.partialorder %v418_v18, 0.5  ;;  %vm1112_vm5 = vcmask 261120  }
  0x9c   : > { %1432 = vmatpush3.bf16.msra.mxu0 %v1431_v4  ;;  %s1757_s14 = smov 104   ;;  %s1758_s16 = smov 56  }
  0x9d   : > { %1384 = vmatprep.subr.mxu0 %v1750_v1  ;;  %s1759_s30 = smov 64   ;;  %s1760_s15 = smov 48  }
  0x9e   : > { %s1761_s17 = smov 40   ;;  %s1762_s29 = smov 8  }
  0x9f   : > { %1377 = vmatmul.mubr.msk.f32.vlgmr.msra.gmra.mrb[0].mxu0 %vm343_vm1, %v333_v5  ;;  %s1763_s7 = smov 16   ;;  %s1764_s8 = smov 24  }
  0xa0   : > { %1386 = vmatprep.mubr.msk.f32.mxu0 %vm1749_vm0, %v1750_v1  ;;  %p2181_p13 = scmp.ne.s32.totalorder %s2172_s9, 0 }
 0x172   : > { %v413_v7 = vpop.f32.mrb[0].mxu0 }
 0x173   : > { %v2039_v8 = vadd.f32 %v1328_v6, %v413_v7  ;;  %v1378_v9 = vpop.f32.mrb[1].mxu0 }
 0x174   : > { %v1101_v9 = vld [vmem:[#allocation8] sm:$0xff] }
 0x175   : > { %421 = vrot.lane.b32.xlu0 %v2039_v8, %s1751_s13  ;;  %v417_v10 = vmul.f32 0.35355338, %v2039_v8  ;;  %s1345_s13 = sshll.u32 %s1822_s25, 7  ;;  %s1765_s25 = smov [#allocation10]  }
 0x177   : > { %587 = vrot.lane.b32.xlu1 %v417_v10, %s1752_s12  ;;  %s332_s12 = scalar_lea.vmem [#allocation10], %s2004_s4  ;;  %s1666_s4 = sshll.u32 %s1765_s25, 4  ;;  %s1667_s4 = int_to_ptr.vmem [resolvable:$false] %s1666_s4 }
 0x179   : > { %589 = vrot.lane.b32.xlu0 %v2039_v8, %s1753_s2  ;;  %s1201_s2 = sshll.u32 %s332_s12, 4  ;;  %s2110_s2 = int_to_ptr.vmem [resolvable:$true] %s1201_s2 }
 0x17a   : > { %p1669_p4 = scmp.lt.s32.totalorder %s2110_s2, %s1667_s4 }
 0x17b   : > { %755 = vrot.lane.b32.xlu1 %v2039_v8, %s1754_s19 }
 0x17d   : > { %753 = vrot.lane.b32.xlu0 %v417_v10, %s1755_s11 }
 0x17f   : > { %921 = vrot.lane.b32.xlu1 %v2039_v8, %s1756_s10  ;;  %s2108_s10 = scalar_lea.hbm %s2158_s6, %s1345_s13 }
 0x181   : > { %919 = vrot.lane.b32.xlu0 %v417_v10, %s1757_s14  ;;  %s1188_s14 = scalar_lea.sflag [#allocation4], %s2001_s20 }
 0x1e7   : > { %v422_v11 = vpop.permute.xlu0 %421 }
 0x1e8   : > { %1380 = vmatpush3.xpose.msk.msra.mxu1 %vm423_vm2, %v422_v11 }
 0x1e9   : > { %v588_v12 = vpop.permute.xlu1 %587  ;;  %1389 = vmatprep.subr.mxu1 %v1750_v1 }
 0x1eb   : > { %v590_v13 = vpop.permute.xlu0 %589  ;;  %1382 = vmatmul.mubr.msk.f32.vlgmr.msra.gmra.mrb[0].mxu1 %vm423_vm2, %v417_v10  ;;  %v1102_v10 = vld [vmem:[#allocation8 + $0x8] sm:$0xff] }
 0x1ec   : > { %1390 = vmatpush3.xpose.msk.msra.mxu1 %vm423_vm2, %v590_v13  ;;  %1391 = vmatprep.mubr.msk.f32.mxu1 %vm1749_vm0, %v1750_v1  ;;  %v1434_v11 = vpack.c.bf16 %v1102_v10, %v1101_v9 }
 0x1ed   : > { %v756_v14 = vpop.permute.xlu1 %755  ;;  %1399 = vmatprep.subr.mxu1 %v1750_v1 }
 0x1ef   : > { %1392 = vmatmul.mubr.msk.f32.vlgmr.msra.gmra.mrb[2].mxu1 %vm423_vm2, %v588_v12  ;;  %v754_v15 = vpop.permute.xlu0 %753 }
 0x1f0   : > { %1400 = vmatpush3.xpose.msk.msra.mxu1 %vm423_vm2, %v756_v14  ;;  %1401 = vmatprep.mubr.msk.f32.mxu1 %vm1749_vm0, %v1750_v1 }
 0x1f1   : > { %1409 = vmatprep.subr.mxu1 %v1750_v1  ;;  %v922_v16 = vpop.permute.xlu1 %921 }
 0x1f3   : > { %1402 = vmatmul.mubr.msk.f32.vlgmr.msra.gmra.mrb[4].mxu1 %vm423_vm2, %v754_v15  ;;  %v920_v17 = vpop.permute.xlu0 %919 }
 0x1f4   : > { %1410 = vmatpush3.xpose.msk.msra.mxu1 %vm423_vm2, %v922_v16  ;;  %1411 = vmatprep.mubr.msk.f32.mxu1 %vm1749_vm0, %v1750_v1  ;;  %v1103_v16 = vld [vmem:[#allocation8 + $0x10] sm:$0xff] }
 0x1f5   : > { %1433 = vmatprep.subr.bf16.mxu1 %v1748_v0 }
 0x1f7   : > { %1412 = vmatmul.mubr.msk.f32.vlgmr.msra.gmra.mrb[6].mxu1 %vm423_vm2, %v920_v17  ;;  %v1104_v17 = vld [vmem:[#allocation8 + $0x18] sm:$0xff] }
 0x1f8   : > { %1427 = vmatprep.mubr.msk.f32.mxu1 %vm1749_vm0, %v1750_v1  ;;  %1435 = vmatpush3.bf16.msra.mxu1 %v1434_v11  ;;  %v1437_v18 = vpack.c.bf16 %v1104_v17, %v1103_v16 }
 0x1f9   : > { %1436 = vmatprep.subr.bf16.mxu1 %v1748_v0 }
 0x1fc   : > { %1438 = vmatpush3.bf16.msra.mxu1 %v1437_v18 }
 0x2be   : > { %v495_v19 = vpop.f32.mrb[0].mxu1 }
 0x2bf   : > { %v499_v20 = vsel %vm419_vm3, %v495_v19, -1e+09  ;;  %v1383_v21 = vpop.f32.mrb[1].mxu1 }
 0x2c0   : > { %v500_v22 = vsel %vm423_vm2, %v499_v20, -inf }
 0x2c1   : > { %501 = vmax.xlane.f32.xlu1 %v500_v22 }
 0x2c2   : > { %v661_v23 = vpop.f32.mrb[2].mxu1 }
 0x2c3   : > { %v665_v24 = vsel %vm419_vm3, %v661_v23, -1e+09  ;;  %v1393_v25 = vpop.f32.mrb[3].mxu1 }
 0x2c4   : > { %v666_v26 = vsel %vm423_vm2, %v665_v24, -inf }
 0x2c5   : > { %667 = vmax.xlane.f32.xlu0 %v666_v26 }
 0x2c6   : > { %v827_v27 = vpop.f32.mrb[4].mxu1 }
 0x2c7   : > { %v831_v28 = vsel %vm419_vm3, %v827_v27, -1e+09  ;;  %v1403_v29 = vpop.f32.mrb[5].mxu1  ;;  %v1342_v27 = vld [vmem:[%s2157_s5] ss:$0 sm:$0xff] }
 0x2c8   : > { %v832_v30 = vsel %vm423_vm2, %v831_v28, -inf }
 0x2c9   : > { %833 = vmax.xlane.f32.xlu0 %v832_v30 }
 0x2ca   : > { %v993_v31 = vpop.f32.mrb[6].mxu1 }
 0x2cb   : > { %v997_v32 = vsel %vm419_vm3, %v993_v31, -1e+09  ;;  %v1413_v33 = vpop.f32.mrb[7].mxu1 }
 0x2cc   : > { %v998_v34 = vsel %vm423_vm2, %v997_v32, -inf }
 0x2cd   : > { %999 = vmax.xlane.f32.xlu1 %v998_v34 }
 0x2de   : > { %677 = vrot.lane.b32.xlu1 %v2039_v8, %s1758_s16  ;;  %s1662_s16 = scalar_lea.vmem %s2110_s2, 128 }
 0x2df   : > { %p1663_p2 = scmp.ne.s32.totalorder %s2110_s2, %s1662_s16 }
 0x2e1   : > { %p1664_p6 = pnand %p1663_p2, %p2181_p13 }
 0x2e3   : > { %p1665_p10 = pneg %p1664_p6 }
 0x34e   : > { %v502_v35 = vpop.xlane.xlu1 %501 }
 0x34f   : > { %v503_v36 = vsub.f32 %v499_v20, %v502_v35 }
 0x351   : > { %v504_v37 = vmul.f32 1.442695, %v503_v36 }
 0x352   : > { %v668_v38 = vpop.xlane.xlu0 %667 }
 0x353   : > { %1530 = vpow2.f32 %v504_v37  ;;  %v669_v39 = vsub.f32 %v665_v24, %v668_v38 }
 0x355   : > { %v670_v40 = vmul.f32 1.442695, %v669_v39 }
 0x356   : > { %v834_v50 = vpop.xlane.xlu0 %833 }
 0x357   : > { %1532 = vpow2.f32 %v670_v40  ;;  %v835_v51 = vsub.f32 %v831_v28, %v834_v50 }
 0x359   : > { %v836_v52 = vmul.f32 1.442695, %v835_v51 }
 0x35a   : > { %v1000_v41 = vpop.xlane.xlu1 %999 }
 0x35b   : > { %v1001_v42 = vsub.f32 %v997_v32, %v1000_v41 }
 0x35d   : > { %v1531_v43 = vpop.eup %1530  ;;  %v1002_v44 = vmul.f32 1.442695, %v1001_v42 }
 0x35e   : > { %v506_v45 = vsel %vm423_vm2, %v1531_v43, 0.0  ;;  %v678_v55 = vpop.permute.xlu1 %677 }
 0x35f   : > { %1534 = vpow2.f32 %v1002_v44  ;;  %507 = vadd.xlane.f32.xlu0 %v506_v45 }
 0x360   : > { %1536 = vpow2.f32 %v836_v52 }
 0x361   : > { %v1533_v46 = vpop.eup %1532 }
 0x362   : > { %v672_v47 = vsel %vm423_vm2, %v1533_v46, 0.0 }
 0x363   : > { %673 = vadd.xlane.f32.xlu1 %v672_v47 }
 0x369   : > { %v1535_v48 = vpop.eup %1534 }
 0x36a   : > { %v1004_v49 = vsel %vm423_vm2, %v1535_v48, 0.0  ;;  %v1537_v53 = vpop.eup %1536 }
 0x36b   : > { %1005 = vadd.xlane.f32.xlu1 %v1004_v49  ;;  %v838_v54 = vsel %vm423_vm2, %v1537_v53, 0.0 }
 0x375   : > { %511 = vrot.lane.b32.xlu0 %v2039_v8, %s1759_s30  ;;  %s1668_s30 = scalar_lea.vmem %s1667_s4, 256 }
 0x376   : > { %p1670_p5 = scmp.lt.s32.totalorder %s1668_s30, %s1662_s16 }
 0x378   : > { %p1671_p3 = por %p1670_p5, %p1669_p4 }
 0x37a   : > { %p1672_p7 = pnand %p1671_p3, %p1665_p10 }
 0x37c   : > { %843 = vrot.lane.b32.xlu1 %v2039_v8, %s1760_s15 }
 0x394   : > { %839 = vadd.xlane.f32.xlu0 %v838_v54 }
 0x3aa   : > { %1009 = vrot.lane.b32.xlu0 %v2039_v8, %s1761_s17 }
 0x3ec   : > { %v508_v56 = vpop.xlane.xlu0 %507 }
 0x3ed   : > { %1538 = vrcp.f32 %v508_v56 }
 0x3f0   : > { %v512_v57 = vpop.permute.xlu0 %511  ;;  %v674_v58 = vpop.xlane.xlu1 %673 }
 0x3f1   : > { %1540 = vrcp.f32 %v674_v58  ;;  %1385 = vmatpush3.msra.mxu0 %v512_v57 }
 0x3f2   : > { %1394 = vmatprep.subr.mxu0 %v1750_v1 }
 0x3f7   : > { %v1539_v59 = vpop.eup %1538 }
 0x3f8   : > { %v510_v60 = vmul.f32 %v1539_v59, %v1531_v43  ;;  %v1006_v61 = vpop.xlane.xlu1 %1005 }
 0x3fa   : > { %1387 = vmatmul.mubr.msk.f32.vlgmr.msra.gmra.mrb[2].mxu0 %vm423_vm2, %v510_v60 }
 0x3fb   : > { %v1541_v62 = vpop.eup %1540  ;;  %1395 = vmatpush3.msra.mxu0 %v678_v55  ;;  %1396 = vmatprep.mubr.msk.f32.mxu0 %vm1749_vm0, %v1750_v1 }
 0x3fc   : > { %v676_v63 = vmul.f32 %v1541_v62, %v1533_v46  ;;  %v844_v2 = vpop.permute.xlu1 %843  ;;  %1404 = vmatprep.subr.mxu0 %v1750_v1 }
 0x3fe   : > { %1397 = vmatmul.mubr.msk.f32.vlgmr.msra.gmra.mrb[4].mxu0 %vm423_vm2, %v676_v63 }
 0x3ff   : > { %1405 = vmatpush3.msra.mxu0 %v844_v2  ;;  %1406 = vmatprep.mubr.msk.f32.mxu0 %vm1749_vm0, %v1750_v1 }
 0x400   : > { %1414 = vmatprep.subr.mxu0 %v1750_v1 }
 0x421   : > { %v840_v3 = vpop.xlane.xlu0 %839 }
 0x422   : > { %1542 = vrcp.f32 %v840_v3 }
 0x423   : > { %1544 = vrcp.f32 %v1006_v61 }
 0x425   : > { %v1010_v7 = vpop.permute.xlu0 %1009 }
 0x42c   : > { %v1543_v4 = vpop.eup %1542 }
 0x42d   : > { %v842_v5 = vmul.f32 %v1543_v4, %v1537_v53  ;;  %v1545_v6 = vpop.eup %1544 }
 0x42e   : > { %v1008_v8 = vmul.f32 %v1545_v6, %v1535_v48 }
 0x42f   : > { %1407 = vmatmul.mubr.msk.f32.vlgmr.msra.gmra.mrb[6].mxu0 %vm423_vm2, %v842_v5 }
 0x430   : > { %1415 = vmatpush3.msra.mxu0 %v1010_v7  ;;  %1416 = vmatprep.mubr.msk.f32.mxu0 %vm1749_vm0, %v1750_v1 }
 0x433   : > { %1417 = vmatmul.mubr.msk.f32.vlgmr.msra.gmra.mrb[8].mxu0 %vm423_vm2, %v1008_v8 }
 0x4cd   : > { %v583_v12 = vpop.f32.mrb[2].mxu0 }
 0x4ce   : > { %v1388_v13 = vpop.f32.mrb[3].mxu0 }
 0x4d1   : > { %v749_v14 = vpop.f32.mrb[4].mxu0 }
 0x4d2   : > { %1086 = vrot.lane.b32.xlu1 %v749_v14, %s1762_s29  ;;  %v1398_v15 = vpop.f32.mrb[5].mxu0 }
 0x502   : > { %v915_v1 = vpop.f32.mrb[6].mxu0 }
 0x503   : > { %1090 = vrot.lane.b32.xlu0 %v915_v1, %s1763_s7  ;;  %v1408_v19 = vpop.f32.mrb[7].mxu0 }
 0x506   : > { %v1081_v20 = vpop.f32.mrb[8].mxu0 }
 0x507   : > { %1094 = vrot.lane.b32.xlu1 %v1081_v20, %s1764_s8  ;;  %v1418_v0 = vpop.f32.mrb[9].mxu0 }
 0x544   : > { %v1087_v21 = vpop.permute.xlu1 %1086 }
 0x545   : > { %v1097_v23 = vsel %vm423_vm2, %v583_v12, %v1087_v21 }
 0x575   : > { %v1091_v22 = vpop.permute.xlu0 %1090 }
 0x576   : > { %v1098_v24 = vsel %vm343_vm1, %v1097_v23, %v1091_v22 }
 0x579   : > { %v1095_v25 = vpop.permute.xlu1 %1094 }
 0x57a   : > { %v1100_v26 = vsel %vm1099_vm4, %v1098_v24, %v1095_v25 }
 0x57b   : > { %1428 = vmatmul.mubr.msk.f32.vlgmr.msra.gmra.mrb[8].mxu1 %vm1112_vm5, %v1100_v26 }
 0x64e   : > { %v1182_v28 = vpop.f32.mrb[8].mxu1 }
 0x64f   : > { %v1183_v29 = vadd.f32 %v1342_v27, %v1182_v28  ;;  %v1429_v30 = vpop.f32.mrb[9].mxu1 }
 0x651   : > { %1186 = vst [vmem:[%s332_s12] sm:$0xff] %v1183_v29 }
 0x652   : > { %1675 = shalt.err (!%p1672_p7)
}
 0x653   : > { %s1676_s20 = scalar_lea.hbm %s2108_s10, 128  ;;  %s1680_s29 = scalar_lea.hbm %s2158_s6, 256 }
 0x654   : > { %p1677_p1 = scmp.ne.s32.totalorder %s2108_s10, %s1676_s20  ;;  %p1681_p0 = scmp.lt.u32.totalorder %s2108_s10, %s2158_s6 }
 0x655   : > { %p1682_p9 = scmp.lt.u32.totalorder %s1680_s29, %s1676_s20  ;;  %p1684_p2 = scmp.lt.u32.totalorder %s1676_s20, %s2108_s10 }
 0x656   : > { %p1678_p8 = pnand %p1677_p1, %p2181_p13 }
 0x657   : > { %p1683_p12 = por %p1682_p9, %p1681_p0 }
 0x658   : > { %p1679_p11 = pneg %p1678_p8 }
 0x659   : > { %p1685_p6 = por %p1684_p2, %p1683_p12 }
 0x65b   : > { %p1686_p10 = pnand %p1685_p6, %p1679_p11 }
 0x65d   : > { %1689 = shalt.err (!%p1686_p10)
}
 0x65e   : > { %1451 = dma.vmem_to_hbm [thread:$0]  (%p2181_p13), %s2110_s2, 128, %s2108_s10, %s1188_s14  }
 0x65f PF: > { %s1213_s27 = sand.u32 1, %s1728_s21   ;;  %p2182_p4 = scmp.ne.s32.totalorder %s2166_s28, 0 }
 0x660   : > { %p2183_p5 = scmp.ge.s32.totalorder %s1740_s24, 2  ;;  %s1214_s18 = scalar_lea.sflag [#allocation4], %s1213_s27 }
 0x662   : > { %p1468_p3 = pnand %p2183_p5, %p2182_p4 }
 0x664   : > { %1723 = dma.done.wait (!%p1468_p3), %s1214_s18, 128  }
 0x665   : > { %1725 = vsyncadd (!%p1468_p3), %s1214_s18, 4294967168  ;;  %s2184_s13 = sld [smem:[#allocation16_spill]]  ;;  %p23_p7 = scmp.ge.s32.totalorder %s1911_s26, 4  }
 0x666   : > { %s2185_s21 = smov %s1732_s22  ;;  %s2186_s22 = smov %s1736_s23 }
 0x667   : > { %s2188_s24 = smov %s1911_s26  ;;  %25 = sbr.rel (!%p23_p7) target bundleno = 11 (0xb), region = 110 }
 0x66b   : > { %s2187_s23 = smov %s2184_s13 }
 0x66e   :  { %1219 = vsyncpa [#allocation3], 1 }
 0x66f   :  { %1221 = vsyncpa [#allocation3 + $0x1], 1 }
 0x670   :  { %1222 = vsyncpa [#allocation6], 1 }
 0x671   :  { %1224 = vsyncpa [#allocation6 + $0x1], 1 }
 0x672   :  { %1225 = vsyncpa [#allocation9], 1 }
 0x673   :  { %1226 = vsyncpa [#allocation4], 1 }
 0x674   :  { %1228 = vsyncpa [#allocation4 + $0x1], 1 }

</bundles_post_ra>
